<compile_context>
chip_gen: v7x
topology: tpu7x:2x2x1
jax: 0.10.0
libtpu: 0.0.40
codegen_flags: <defaults>
</compile_context>

<pallas_src>
import jax
import jax.numpy as jnp
from jax.experimental import pallas as pl
from jax.experimental.pallas import tpu as pltpu


def _drop_path_kernel(x_ref, scale_ref, o_ref):
    x = x_ref[...].astype(jnp.float32)          # (tb, tn)
    s = scale_ref[...].astype(jnp.float32)      # (tb, 1) -> lane broadcast
    o_ref[...] = (x * s).astype(o_ref.dtype)


def drop_path(x, drop_prob: float = 0.0, training: bool = False, *,
              key=None, block_n=None):
    """Stochastic depth. x: (B, ...). Returns array of same shape/dtype."""
    if drop_prob == 0.0 or not training:
        # Identity fast path — same as the PyTorch module in eval / p=0.
        return x
    if key is None:
        raise ValueError("drop_path: `key` is required when training with drop_prob > 0")

    keep_prob = 1.0 - drop_prob
    B = x.shape[0]

    # Per-sample binary keep mask, identical recipe to the torch reference:
    # floor(keep_prob + U[0,1)).  Folded with 1/keep_prob into one scale so the
    # kernel body is a single multiply.
    u = jax.random.uniform(key, (B, 1), dtype=jnp.float32)
    scale = jnp.floor(keep_prob + u) / keep_prob          # (B, 1): 0 or 1/keep_prob

    xs = x.reshape(B, -1)
    N = xs.shape[1]

    if block_n is None:
        # Small working set (or non-128-multiple feature dim) -> single grid
        # step with whole arrays resident in VMEM.
        if N % 128 != 0 or B * N * xs.dtype.itemsize <= (8 << 20):
            block_n = N
        else:
            # Lane-dense feature tiles for big inputs; keep them multiples of 128.
            block_n = 512 * 128
            while N % block_n != 0:
                block_n //= 2
    grid = (N // block_n,)

    out = pl.pallas_call(
        _drop_path_kernel,
        out_shape=jax.ShapeDtypeStruct((B, N), x.dtype),
        grid_spec=pltpu.PrefetchScalarGridSpec(
            num_scalar_prefetch=0,
            grid=grid,
            in_specs=[
                pl.BlockSpec((B, block_n), lambda j: (0, j)),   # x tile
                pl.BlockSpec((B, 1), lambda j: (0, 0)),          # per-sample scale
            ],
            out_specs=pl.BlockSpec((B, block_n), lambda j: (0, j)),
        ),
        compiler_params=pltpu.CompilerParams(
            dimension_semantics=("parallel",)),
    )(xs, scale)
    return out.reshape(x.shape)


if __name__ == "__main__":
    # Small shapes consistent with the module: batch=2, channels=4, 16x16 spatial.
    B, C, H, W = 2, 4, 16, 16
    drop_prob = 0.25

    key = jax.random.PRNGKey(0)
    k_x, k_mask = jax.random.split(key)
    x = jax.random.normal(k_x, (B, C, H, W), dtype=jnp.float32)

    # Training path (runs the Pallas kernel).
    y = drop_path(x, drop_prob=drop_prob, training=True, key=k_mask)
    y = jax.block_until_ready(y)

    # Pure-JAX reference (same mask recipe as the torch implementation).
    keep_prob = 1.0 - drop_prob
    u = jax.random.uniform(k_mask, (B, 1), dtype=jnp.float32)
    mask = jnp.floor(keep_prob + u)
    y_ref = (x / keep_prob) * mask.reshape(B, 1, 1, 1)
    assert jnp.allclose(y, y_ref, atol=1e-6), "training-path mismatch"

    # Eval mode and drop_prob == 0 are identity.
    y_eval = drop_path(x, drop_prob=drop_prob, training=False)
    assert jnp.allclose(y_eval, x)
    y_p0 = drop_path(x, drop_prob=0.0, training=True, key=k_mask)
    assert jnp.allclose(y_p0, x)

    print("KERNEL_OK")
</pallas_src>

<mosaic_0001>
module attributes {stable_mosaic.version = 11 : i64} {
  func.func @_drop_path_kernel(%arg0: i32, %arg1: memref<2x1024xf32, #tpu.memory_space<vmem>>, %arg2: memref<2x1xf32, #tpu.memory_space<vmem>>, %arg3: memref<2x1024xf32, #tpu.memory_space<vmem>>) attributes {dimension_semantics = [#tpu.dimension_semantics<parallel>], iteration_bounds = array<i64: 1>, scalar_prefetch = 0 : i64, scratch_operands = 0 : i64, tpu.core_type = #tpu.core_type<tc>, window_params = [{transform_indices = @transform_0, window_bounds = array<i64: 2, 1024>}, {pipeline_mode = #tpu.pipeline_mode<synchronous>, transform_indices = @transform_1, window_bounds = array<i64: 2, 1>}, {transform_indices = @transform_2, window_bounds = array<i64: 2, 1024>}]} {
    %c0 = arith.constant 0 : index
    %c0_0 = arith.constant 0 : index
    %0 = vector.load %arg1[%c0, %c0_0] : memref<2x1024xf32, #tpu.memory_space<vmem>>, vector<2x1024xf32>
    %c0_1 = arith.constant 0 : index
    %c0_2 = arith.constant 0 : index
    %1 = vector.load %arg2[%c0_1, %c0_2] : memref<2x1xf32, #tpu.memory_space<vmem>>, vector<2x1xf32>
    %2 = vector.broadcast %1 : vector<2x1xf32> to vector<2x1024xf32>
    %3 = arith.mulf %0, %2 : vector<2x1024xf32>
    %c0_3 = arith.constant 0 : index
    %c0_4 = arith.constant 0 : index
    %4 = vector.load %arg3[%c0_3, %c0_4] : memref<2x1024xf32, #tpu.memory_space<vmem>>, vector<2x1024xf32>
    tpu.vector_store %arg3[%c0_3, %c0_4], %3 {strides = array<i32>} : memref<2x1024xf32, #tpu.memory_space<vmem>>, vector<2x1024xf32>,
    return
  }
  func.func @transform_0(%arg0: i32) -> (i32, i32) {
    %c0_i32 = arith.constant 0 : i32
    %c0_i32_0 = arith.constant 0 : i32
    return %c0_i32, %arg0 : i32, i32
  }
  func.func @transform_1(%arg0: i32) -> (i32, i32) {
    %c0_i32 = arith.constant 0 : i32
    %c0_i32_0 = arith.constant 0 : i32
    %c0_i32_1 = arith.constant 0 : i32
    return %c0_i32, %c0_i32_0 : i32, i32
  }
  func.func @transform_2(%arg0: i32) -> (i32, i32) {
    %c0_i32 = arith.constant 0 : i32
    %c0_i32_0 = arith.constant 0 : i32
    return %c0_i32, %arg0 : i32, i32
  }
}

</mosaic_0001>

<bundles_post_ra>
// kernel: tpu_custom_call.1
= control target key start
LH: loop header
LB: loop body
LE: loop exit
PB: predicated region body
PF: predicated region fallthrough
CT: control target
= control target key end

     0   :  { %7 = vsyncpa [#allocation3], 0  ;;  %s157_s0 = inlined_call_operand.hbm [shape: f32[2,1024], index: 0, kind: input, shape index: {}]   ;;  %s158_s1 = inlined_call_operand.vmem [shape: f32[2,1], index: 1, kind: input, shape index: {}]   ;;  %s159_s2 = inlined_call_operand.hbm [shape: f32[2,1024], index: 2, kind: output, shape index: {}]  }
   0x1   :  { %8 = vsyncpa [#allocation4], 0  ;;  %s111_s9 = smov [#allocation2]   ;;  %s63_s13 = scalar_lea.hbm %s157_s0, 256 }
   0x2   :  { %s15_s10 = sshll.u32 %s111_s9, 4  ;;  %p64_p0 = scmp.ne.s32.totalorder %s157_s0, %s63_s13  ;;  %s16_s10 = int_to_ptr.vmem [resolvable:$true] %s15_s10 }
   0x3   :  { %p67_p1 = scmp.lt.u32.totalorder %s63_s13, %s157_s0 }
   0x5   :  { %p69_p2 = pnand %p67_p1, %p64_p0 }
   0x7   :  { %72 = shalt.err (!%p69_p2)
}
   0x8   :  { %s73_s18 = scalar_lea.vmem %s16_s10, 256  ;;  %p78_p4 = scmp.lt.s32.totalorder %s16_s10, %s16_s10 }
   0x9   :  { %p74_p3 = scmp.ne.s32.totalorder %s16_s10, %s73_s18  ;;  %p79_p5 = scmp.lt.s32.totalorder %s73_s18, %s73_s18 }
   0xb   :  { %p80_p6 = por %p79_p5, %p78_p4 }
   0xd   :  { %p81_p7 = pnand %p80_p6, %p74_p3 }
   0xf   :  { %84 = shalt.err (!%p81_p7)
}
  0x10   :  { %18 = dma.hbm_to_vmem [thread:$0]  %s157_s0, 256, %s16_s10, [#allocation3]  }
  0x11   :  { %107 = dma.done.wait [#allocation3], 256  }
  0x12   :  { %108 = vsyncadd [#allocation3], 4294967040  ;;  %v112_v0 = vmov 0   ;;  %v26_v1 = vld [vmem:[%s158_s1] sm:$0x3]  ;;  %v34_v4 = vlaneseq  ;;  %v25_v10 = vld [vmem:[#allocation2 + $0x8] sm:$0xff] }
  0x13   :  { %62 = vset.pattern.permute.xlu0 %v112_v0  ;;  %v113_v2 = vmov 269488144   ;;  %v24_v9 = vld [vmem:[#allocation2] sm:$0xff]  ;;  %s114_s23 = smov [#allocation5]  }
  0x14   :  { %29 = vperm.xlu0 %62, %v26_v1   ;;  %v32_v3 = vunpack.c.l.s4 %v113_v2  ;;  %v35_v6 = vshrl.u32 %v34_v4, 7  ;;  %s49_s0 = sshll.u32 %s114_s23, 4  ;;  %s50_s0 = int_to_ptr.vmem [resolvable:$true] %s49_s0 }
  0x15   :  { %s85_s24 = scalar_lea.vmem %s50_s0, 256  ;;  %p90_p9 = scmp.lt.s32.totalorder %s50_s0, %s50_s0 }
  0x16   :  { %v33_v5 = vunpack.c.0.s8 %v32_v3  ;;  %p86_p8 = scmp.ne.s32.totalorder %s50_s0, %s85_s24  ;;  %p91_p10 = scmp.lt.s32.totalorder %s85_s24, %s85_s24 }
  0x18   :  { %v36_v7 = vsub.s32 %v33_v5, %v35_v6  ;;  %p92_p11 = por %p91_p10, %p90_p9 }
  0x1a   :  { %p93_p12 = pnand %p92_p11, %p86_p8 }
  0x93   :  { %v30_v8 = vpop.permute.xlu0 %29 }
  0x94   :  { %v37_v11 = vrot.slane %v30_v8, %v36_v7 }
  0x96   :  { %v39_v12 = vmul.f32 %v37_v11, %v24_v9  ;;  %v40_v13 = vmul.f32 %v37_v11, %v25_v10 }
  0x98   :  { %41 = vst [vmem:[#allocation5] sm:$0xff] %v39_v12  ;;  %42 = vst [vmem:[#allocation5 + $0x8] sm:$0xff] %v40_v13 }
  0x99   :  { %96 = shalt.err (!%p93_p12)
}
  0x9a   :  { %s97_s26 = scalar_lea.hbm %s159_s2, 256 }
  0x9b   :  { %p98_p13 = scmp.ne.s32.totalorder %s159_s2, %s97_s26  ;;  %p101_p0 = scmp.lt.u32.totalorder %s97_s26, %s159_s2 }
  0x9d   :  { %p103_p1 = pnand %p101_p0, %p98_p13 }
  0x9f   :  { %106 = shalt.err (!%p103_p1)
}
  0xa0   :  { %52 = dma.vmem_to_hbm [thread:$0]  %s50_s0, 256, %s159_s2, [#allocation4]  }
  0xa1   :  { %109 = dma.done.wait [#allocation4], 256  }
  0xa2   :  { %110 = vsyncadd [#allocation4], 4294967040 }
  0xa3   :  { %56 = vsyncpa [#allocation3], 1 }
  0xa4   :  { %57 = vsyncpa [#allocation4], 1 }

</bundles_post_ra>
